<compile_context>
chip_gen: v7x
topology: tpu7x:2x2x1
jax: 0.10.0
libtpu: 0.0.40
codegen_flags: <defaults>
</compile_context>

<pallas_src>
import jax
import jax.numpy as jnp
from jax.experimental import pallas as pl
from jax.experimental.pallas import tpu as pltpu


# --------------------------------------------------------------------------
# Model configuration (synthetic, small, consistent with the module)
# --------------------------------------------------------------------------
INPUT_DIM = 64                        # latent input dimension
OUTPUT_IM_DIMS = (4, 8, 8)            # (C, H, W)
OUTPUT_DIM = OUTPUT_IM_DIMS[0] * OUTPUT_IM_DIMS[1] * OUTPUT_IM_DIMS[2]  # 256
# DoublingLinearNetwork: 64 -> 128 -> 256  (two Linear layers)
HIDDEN_DIM = INPUT_DIM * 2            # 128
BATCH = 32                            # demo batch (wrapper adapts to any batch)

MAX_BATCH_TILE = 1024                 # big tiles amortize the ~600-cycle/step cost
MIN_ROWS_PER_STEP = 256               # only split the batch axis when each grid
                                      # step gets at least this many rows

# TODO(synk): flip to jnp.bfloat16 if downstream tolerates ~3-decimal-digit
# outputs — the f32 output write is ~85-90% of this kernel's HBM bytes.
OUTPUT_DTYPE = jnp.float32


# --------------------------------------------------------------------------
# Pallas kernel: fused  Linear -> ReLU -> Linear -> Sigmoid
# --------------------------------------------------------------------------
def decoder_kernel(x_ref, w1_ref, b1_ref, w2_ref, b2_ref, o_ref):
    # x arrives in f32; cast to bf16 in-kernel (VPU, hidden under DMA/MXU).
    x_bf = x_ref[...].astype(jnp.bfloat16)

    # layer 1: bf16 MXU matmul, f32 accumulate; bias + ReLU (in_activation) in f32
    h = jnp.dot(x_bf, w1_ref[...], preferred_element_type=jnp.float32)
    h = jnp.maximum(h + b1_ref[...], 0.0)        # b1: (1, D_hid) broadcasts over rows

    # layer 2 (final Linear): NO in_activation after the last layer of the
    # DoublingLinearNetwork — only the module-level out_activation follows.
    f = jnp.dot(h.astype(jnp.bfloat16), w2_ref[...],
                preferred_element_type=jnp.float32)
    f = f + b2_ref[...]                          # b2: (1, D_out)

    # out_activation: Sigmoid = 1 / (1 + exp(-f)).  EUP exp + approx EUP
    # reciprocal (skips the full-precision divide's extra refinement step).
    sig = pl.reciprocal(1.0 + jnp.exp(-f), approx=True)
    o_ref[...] = sig.astype(o_ref.dtype)


# --------------------------------------------------------------------------
# Batch-tile selection: one big step for small batches; split only when each
# step gets substantial work (>= MIN_ROWS_PER_STEP rows), cap at MAX_BATCH_TILE.
# --------------------------------------------------------------------------
def _pick_batch_tile(batch):
    b8 = ((batch + 7) // 8) * 8                  # sublane-align
    if b8 <= 2 * MIN_ROWS_PER_STEP:
        # Single grid step: on v5e/v6e the grid is a purely sequential loop, so
        # extra steps are pure overhead; on v7x megacore splitting only pays
        # once each TensorCore gets >= MIN_ROWS_PER_STEP rows.
        return min(b8, MAX_BATCH_TILE)
    return MAX_BATCH_TILE


def image_decoder_forward(x, w1_bf, b1, w2_bf, b2, output_im_dims=OUTPUT_IM_DIMS):
    """x: (B, INPUT_DIM) float32 -> (B, C, H, W) OUTPUT_DTYPE (NCHW).

    w1_bf / w2_bf are bf16 (pre-cast once at init, outside the hot path);
    b1 / b2 are f32 with shape (1, D).
    """
    B, d_in = x.shape
    d_hid = w1_bf.shape[1]
    d_out = w2_bf.shape[1]

    tile = _pick_batch_tile(B)
    grid_steps = pl.cdiv(B, tile)
    b_pad = grid_steps * tile                    # pad-to-tile (no divisor hunt)
    if b_pad != B:
        x = jnp.pad(x, ((0, b_pad - B), (0, 0)))

    cost = pl.CostEstimate(
        flops=2 * b_pad * (d_in * d_hid + d_hid * d_out),
        transcendentals=b_pad * d_out,                       # sigmoid exp
        bytes_accessed=(b_pad * d_in * 4                     # x (f32)
                        + d_in * d_hid * 2 + d_hid * d_out * 2   # weights (bf16)
                        + d_hid * 4 + d_out * 4              # biases (f32)
                        + b_pad * d_out * jnp.dtype(OUTPUT_DTYPE).itemsize),
    )

    out_flat = pl.pallas_call(
        decoder_kernel,
        out_shape=jax.ShapeDtypeStruct((b_pad, d_out), OUTPUT_DTYPE),
        grid_spec=pltpu.PrefetchScalarGridSpec(
            num_scalar_prefetch=0,
            grid=(grid_steps,),
            in_specs=[
                # activations: tiled over batch rows (f32, cast in-kernel)
                pl.BlockSpec((tile, d_in), lambda i: (i, 0)),
                # weights / biases: full tensors, same block every step
                # (constant-index => stay resident in VMEM across steps)
                pl.BlockSpec((d_in, d_hid), lambda i: (0, 0)),
                pl.BlockSpec((1, d_hid), lambda i: (0, 0)),
                pl.BlockSpec((d_hid, d_out), lambda i: (0, 0)),
                pl.BlockSpec((1, d_out), lambda i: (0, 0)),
            ],
            out_specs=pl.BlockSpec((tile, d_out), lambda i: (i, 0)),
        ),
        compiler_params=pltpu.CompilerParams(
            dimension_semantics=("parallel",),   # batch axis shards across TCs (v7x)
        ),
        cost_estimate=cost,
    )(x, w1_bf, b1, w2_bf, b2)

    C, H, W = output_im_dims
    if b_pad != B:
        # slice + reshape in one expression (fused by XLA where possible)
        return out_flat[:B].reshape(-1, C, H, W)
    # equivalent to torch's out.view(-1, C, H, W)
    return out_flat.reshape(-1, C, H, W)


# --------------------------------------------------------------------------
# Deterministic parameter initialization (mimics nn.Linear default init).
# Weights are stored in bf16 ONCE here, so the forward call does no casting.
# --------------------------------------------------------------------------
def init_params(key):
    k1, k2, k3, k4 = jax.random.split(key, 4)
    bound1 = 1.0 / jnp.sqrt(INPUT_DIM)
    bound2 = 1.0 / jnp.sqrt(HIDDEN_DIM)
    w1 = jax.random.uniform(k1, (INPUT_DIM, HIDDEN_DIM), jnp.float32, -bound1, bound1)
    b1 = jax.random.uniform(k2, (1, HIDDEN_DIM), jnp.float32, -bound1, bound1)
    w2 = jax.random.uniform(k3, (HIDDEN_DIM, OUTPUT_DIM), jnp.float32, -bound2, bound2)
    b2 = jax.random.uniform(k4, (1, OUTPUT_DIM), jnp.float32, -bound2, bound2)
    return w1.astype(jnp.bfloat16), b1, w2.astype(jnp.bfloat16), b2


def reference_forward(x, w1_bf, b1, w2_bf, b2, output_im_dims=OUTPUT_IM_DIMS):
    # f32 reference over the *stored* (bf16-valued) weights: ReLU between layers
    # only, sigmoid out_activation, NCHW view.
    w1 = w1_bf.astype(jnp.float32)
    w2 = w2_bf.astype(jnp.float32)
    h = jnp.maximum(x @ w1 + b1, 0.0)
    f = h @ w2 + b2
    out = jax.nn.sigmoid(f)
    C, H, W = output_im_dims
    return out.reshape(-1, C, H, W)


if __name__ == "__main__":
    key = jax.random.PRNGKey(0)
    k_params, k_x = jax.random.split(key)

    w1_bf, b1, w2_bf, b2 = init_params(k_params)
    x = jax.random.normal(k_x, (BATCH, INPUT_DIM), jnp.float32)

    out = image_decoder_forward(x, w1_bf, b1, w2_bf, b2)
    out = jax.block_until_ready(out)

    ref = reference_forward(x, w1_bf, b1, w2_bf, b2)
    assert out.shape == (BATCH, *OUTPUT_IM_DIMS), out.shape
    # bf16 MXU inputs (x rounded in-kernel) with f32 accumulation + approx
    # reciprocal in the sigmoid: compare to the f32 reference at bf16-level
    # tolerance (sigmoid output range is [0, 1]).
    assert jnp.allclose(out.astype(jnp.float32), ref, atol=2e-2, rtol=0.0), float(
        jnp.max(jnp.abs(out.astype(jnp.float32) - ref)))

    print("KERNEL_OK")
</pallas_src>

<mosaic_0001>
module attributes {stable_mosaic.version = 11 : i64} {
  func.func @decoder_kernel(%arg0: i32, %arg1: memref<32x64xf32, #tpu.memory_space<vmem>>, %arg2: memref<64x128xbf16, #tpu.memory_space<vmem>>, %arg3: memref<1x128xf32, #tpu.memory_space<vmem>>, %arg4: memref<128x256xbf16, #tpu.memory_space<vmem>>, %arg5: memref<1x256xf32, #tpu.memory_space<vmem>>, %arg6: memref<32x256xf32, #tpu.memory_space<vmem>>) attributes {dimension_semantics = [#tpu.dimension_semantics<parallel>], iteration_bounds = array<i64: 1>, scalar_prefetch = 0 : i64, scratch_operands = 0 : i64, tpu.core_type = #tpu.core_type<tc>, window_params = [{transform_indices = @transform_0, window_bounds = array<i64: 32, 64>}, {pipeline_mode = #tpu.pipeline_mode<synchronous>, transform_indices = @transform_1, window_bounds = array<i64: 64, 128>}, {pipeline_mode = #tpu.pipeline_mode<synchronous>, transform_indices = @transform_2, window_bounds = array<i64: 1, 128>}, {pipeline_mode = #tpu.pipeline_mode<synchronous>, transform_indices = @transform_3, window_bounds = array<i64: 128, 256>}, {pipeline_mode = #tpu.pipeline_mode<synchronous>, transform_indices = @transform_4, window_bounds = array<i64: 1, 256>}, {transform_indices = @transform_5, window_bounds = array<i64: 32, 256>}]} {
    %c0 = arith.constant 0 : index
    %c0_0 = arith.constant 0 : index
    %0 = vector.load %arg1[%c0, %c0_0] : memref<32x64xf32, #tpu.memory_space<vmem>>, vector<32x64xf32>
    %1 = arith.truncf %0 : vector<32x64xf32> to vector<32x64xbf16>
    %c0_1 = arith.constant 0 : index
    %c0_2 = arith.constant 0 : index
    %2 = vector.load %arg2[%c0_1, %c0_2] : memref<64x128xbf16, #tpu.memory_space<vmem>>, vector<64x128xbf16>
    %cst = arith.constant dense<0.000000e+00> : vector<32x128xf32>
    %3 = tpu.matmul %1, %2, %cst {dimension_numbers = #tpu.dot_dimension_numbers<[1], [0], [0], [1], [0, 0, 1, 1], [], []>} : vector<32x64xbf16>, vector<64x128xbf16>, vector<32x128xf32> -> vector<32x128xf32>
    %c0_3 = arith.constant 0 : index
    %c0_4 = arith.constant 0 : index
    %4 = vector.load %arg3[%c0_3, %c0_4] : memref<1x128xf32, #tpu.memory_space<vmem>>, vector<1x128xf32>
    %5 = vector.broadcast %4 : vector<1x128xf32> to vector<32x128xf32>
    %6 = arith.addf %3, %5 : vector<32x128xf32>
    %cst_5 = arith.constant 0.000000e+00 : f32
    %7 = vector.broadcast %cst_5 : f32 to vector<32x128xf32>
    %8 = arith.maximumf %6, %7 : vector<32x128xf32>
    %9 = arith.truncf %8 : vector<32x128xf32> to vector<32x128xbf16>
    %c0_6 = arith.constant 0 : index
    %c0_7 = arith.constant 0 : index
    %10 = vector.load %arg4[%c0_6, %c0_7] : memref<128x256xbf16, #tpu.memory_space<vmem>>, vector<128x256xbf16>
    %cst_8 = arith.constant dense<0.000000e+00> : vector<32x256xf32>
    %11 = tpu.matmul %9, %10, %cst_8 {dimension_numbers = #tpu.dot_dimension_numbers<[1], [0], [0], [1], [0, 0, 1, 1], [], []>} : vector<32x128xbf16>, vector<128x256xbf16>, vector<32x256xf32> -> vector<32x256xf32>
    %c0_9 = arith.constant 0 : index
    %c0_10 = arith.constant 0 : index
    %12 = vector.load %arg5[%c0_9, %c0_10] : memref<1x256xf32, #tpu.memory_space<vmem>>, vector<1x256xf32>
    %13 = vector.broadcast %12 : vector<1x256xf32> to vector<32x256xf32>
    %14 = arith.addf %11, %13 : vector<32x256xf32>
    %cst_11 = arith.constant 0.000000e+00 : f32
    %15 = vector.broadcast %cst_11 : f32 to vector<32x256xf32>
    %16 = arith.subf %15, %14 : vector<32x256xf32>
    %17 = math.exp %16 : vector<32x256xf32>
    %cst_12 = arith.constant 1.000000e+00 : f32
    %18 = vector.broadcast %cst_12 : f32 to vector<32x256xf32>
    %19 = arith.addf %18, %17 : vector<32x256xf32>
    %20 = tpu.reciprocal %19 {approx = true} : vector<32x256xf32> -> vector<32x256xf32>
    %c0_13 = arith.constant 0 : index
    %c0_14 = arith.constant 0 : index
    %21 = vector.load %arg6[%c0_13, %c0_14] : memref<32x256xf32, #tpu.memory_space<vmem>>, vector<32x256xf32>
    tpu.vector_store %arg6[%c0_13, %c0_14], %20 {strides = array<i32>} : memref<32x256xf32, #tpu.memory_space<vmem>>, vector<32x256xf32>,
    return
  }
  func.func @transform_0(%arg0: i32) -> (i32, i32) {
    %c0_i32 = arith.constant 0 : i32
    %c0_i32_0 = arith.constant 0 : i32
    return %arg0, %c0_i32 : i32, i32
  }
  func.func @transform_1(%arg0: i32) -> (i32, i32) {
    %c0_i32 = arith.constant 0 : i32
    %c0_i32_0 = arith.constant 0 : i32
    %c0_i32_1 = arith.constant 0 : i32
    return %c0_i32, %c0_i32_0 : i32, i32
  }
  func.func @transform_2(%arg0: i32) -> (i32, i32) {
    %c0_i32 = arith.constant 0 : i32
    %c0_i32_0 = arith.constant 0 : i32
    %c0_i32_1 = arith.constant 0 : i32
    return %c0_i32, %c0_i32_0 : i32, i32
  }
  func.func @transform_3(%arg0: i32) -> (i32, i32) {
    %c0_i32 = arith.constant 0 : i32
    %c0_i32_0 = arith.constant 0 : i32
    %c0_i32_1 = arith.constant 0 : i32
    return %c0_i32, %c0_i32_0 : i32, i32
  }
  func.func @transform_4(%arg0: i32) -> (i32, i32) {
    %c0_i32 = arith.constant 0 : i32
    %c0_i32_0 = arith.constant 0 : i32
    %c0_i32_1 = arith.constant 0 : i32
    return %c0_i32, %c0_i32_0 : i32, i32
  }
  func.func @transform_5(%arg0: i32) -> (i32, i32) {
    %c0_i32 = arith.constant 0 : i32
    %c0_i32_0 = arith.constant 0 : i32
    return %arg0, %c0_i32 : i32, i32
  }
}

</mosaic_0001>

<bundles_post_ra>
// kernel: tpu_custom_call.1
= control target key start
LH: loop header
LB: loop body
LE: loop exit
PB: predicated region body
PF: predicated region fallthrough
CT: control target
= control target key end

     0   :  { %10 = vsyncpa [#allocation3], 0  ;;  %s700_s0 = inlined_call_operand.hbm [shape: f32[32,64], index: 0, kind: input, shape index: {}]   ;;  %s701_s1 = inlined_call_operand.hbm [shape: bf16[64,128], index: 1, kind: input, shape index: {}]   ;;  %s702_s2 = inlined_call_operand.vmem [shape: f32[1,128], index: 2, kind: input, shape index: {}]   ;;  %s703_s3 = inlined_call_operand.hbm [shape: bf16[128,256], index: 3, kind: input, shape index: {}]   ;;  %s704_s4 = inlined_call_operand.vmem [shape: f32[1,256], index: 4, kind: input, shape index: {}]   ;;  %s705_s5 = inlined_call_operand.hbm [shape: f32[32,256], index: 5, kind: output, shape index: {}]  }
   0x1   :  { %11 = vsyncpa [#allocation6], 0 }
   0x2   :  { %12 = vsyncpa [#allocation4], 0  ;;  %s603_s18 = smov [#allocation5]   ;;  %s509_s22 = scalar_lea.hbm %s701_s1, 512 }
   0x3   :  { %s30_s19 = sshll.u32 %s603_s18, 4  ;;  %p510_p0 = scmp.ne.s32.totalorder %s701_s1, %s509_s22  ;;  %s31_s19 = int_to_ptr.vmem [resolvable:$true] %s30_s19 }
   0x4   :  { %p513_p1 = scmp.lt.u32.totalorder %s509_s22, %s701_s1 }
   0x6   :  { %p515_p2 = pnand %p513_p1, %p510_p0 }
   0x8   :  { %518 = shalt.err (!%p515_p2)
}
   0x9   :  { %s519_s27 = scalar_lea.vmem %s31_s19, 512  ;;  %p524_p4 = scmp.lt.s32.totalorder %s31_s19, %s31_s19 }
   0xa   :  { %p520_p3 = scmp.ne.s32.totalorder %s31_s19, %s519_s27  ;;  %p525_p5 = scmp.lt.s32.totalorder %s519_s27, %s519_s27 }
   0xc   :  { %p526_p6 = por %p525_p5, %p524_p4 }
   0xe   :  { %p527_p7 = pnand %p526_p6, %p520_p3 }
  0x10   :  { %530 = shalt.err (!%p527_p7)
}
  0x11   :  { %s604_s28 = smov 64   ;;  %s605_s29 = smov 4  }
  0x12   :  { %36 = dma.hbm_to_vmem [thread:$0]  %s701_s1, 512, %s31_s19, [#allocation6], %s604_s28, %s604_s28, %s605_s29  }
  0x13   :  { %s606_s7 = smov [#allocation2]   ;;  %s531_s11 = scalar_lea.hbm %s700_s0, 512 }
  0x14   :  { %s18_s8 = sshll.u32 %s606_s7, 4  ;;  %p532_p8 = scmp.ne.s32.totalorder %s700_s0, %s531_s11  ;;  %s19_s8 = int_to_ptr.vmem [resolvable:$true] %s18_s8 }
  0x15   :  { %p535_p9 = scmp.lt.u32.totalorder %s531_s11, %s700_s0 }
  0x17   :  { %p537_p10 = pnand %p535_p9, %p532_p8 }
  0x19   :  { %540 = shalt.err (!%p537_p10)
}
  0x1a   :  { %s541_s16 = scalar_lea.vmem %s19_s8, 512  ;;  %p546_p12 = scmp.lt.s32.totalorder %s19_s8, %s19_s8 }
  0x1b   :  { %p542_p11 = scmp.ne.s32.totalorder %s19_s8, %s541_s16  ;;  %p547_p13 = scmp.lt.s32.totalorder %s541_s16, %s541_s16 }
  0x1d   :  { %p548_p0 = por %p547_p13, %p546_p12 }
  0x1f   :  { %p549_p1 = pnand %p548_p0, %p542_p11 }
  0x21   :  { %552 = shalt.err (!%p549_p1)
}
  0x22   :  { %s607_s1 = smov 128   ;;  %s608_s17 = smov 8  }
  0x23   :  { %24 = dma.hbm_to_vmem [thread:$0]  %s700_s0, 512, %s19_s8, [#allocation3], %s607_s1, %s607_s1, %s608_s17  }
  0x24   :  { %s609_s20 = smov [#allocation7]   ;;  %s553_s24 = scalar_lea.hbm %s703_s3, 2048 }
  0x25   :  { %s44_s21 = sshll.u32 %s609_s20, 4  ;;  %p554_p2 = scmp.ne.s32.totalorder %s703_s3, %s553_s24  ;;  %s45_s21 = int_to_ptr.vmem [resolvable:$true] %s44_s21 }
  0x26   :  { %p557_p3 = scmp.lt.u32.totalorder %s553_s24, %s703_s3 }
  0x28   :  { %p559_p4 = pnand %p557_p3, %p554_p2 }
  0x2a   :  { %562 = shalt.err (!%p559_p4)
}
  0x2b   :  { %s563_s29 = scalar_lea.vmem %s45_s21, 2048  ;;  %p568_p6 = scmp.lt.s32.totalorder %s45_s21, %s45_s21 }
  0x2c   :  { %p564_p5 = scmp.ne.s32.totalorder %s45_s21, %s563_s29  ;;  %p569_p7 = scmp.lt.s32.totalorder %s563_s29, %s563_s29 }
  0x2e   :  { %p570_p8 = por %p569_p7, %p568_p6 }
  0x30   :  { %p571_p9 = pnand %p570_p8, %p564_p5 }
  0x32   :  { %574 = shalt.err (!%p571_p9)
}
  0x33   :  { %50 = dma.hbm_to_vmem [thread:$0]  %s703_s3, 2048, %s45_s21, [#allocation6], %s607_s1, %s607_s1, %s608_s17  }
  0x34   :  { %597 = dma.done.wait [#allocation3], 512  }
  0x35   :  { %598 = vsyncadd [#allocation3], 4294966784 }
  0x36   :  { %599 = dma.done.wait [#allocation6], 2560  }
  0x37   :  { %600 = vsyncadd [#allocation6], 4294964736  ;;  %v449_v0 = vld [vmem:[#allocation5] sm:$0xff]   ;;  %v450_v1 = vld [vmem:[#allocation5 + $0x8] sm:$0xff]   ;;  %vm108_vm0 = vcmask 523264   ;;  %v610_v26 = vmov 0   ;;  %v188_v42 = vlaneseq }
  0x38   :  { %426 = vmatprep.subr.bf16.mxu0 %v449_v0  ;;  %v451_v2 = vld [vmem:[#allocation5 + $0x10] sm:$0xff]   ;;  %v63_v3 = vld [vmem:[#allocation2] sm:$0xff]  ;;  %v64_v4 = vld [vmem:[#allocation2 + $0x8] sm:$0xff]  ;;  %310 = vmatprep.mubr.bf16.mxu1 %v610_v26 }
  0x39   :  { %427 = vmatpush3.bf16.msra.mxu0 %v449_v0  ;;  %v67_v5 = vpack.c.bf16 %v64_v4, %v63_v3  ;;  %v453_v6 = vld [vmem:[#allocation7 + $0x4] ss:$8 sps:$4 sm:$0xff]   ;;  %v455_v7 = vld [vmem:[#allocation7] ss:$8 sps:$4 sm:$0xff]   ;;  %v456_v8 = vld [vmem:[#allocation7 + $0x14] ss:$8 sps:$4 sm:$0xff]  }
  0x3a   :  { %428 = vmatprep.subr.bf16.mxu0 %v450_v1  ;;  %v452_v9 = vld [vmem:[#allocation5 + $0x18] sm:$0xff]   ;;  %278 = vmatprep.subr.bf16.mxu1 %v453_v6  ;;  %v459_v11 = vld [vmem:[#allocation7 + $0x24] ss:$8 sps:$4 sm:$0xff]   ;;  %v65_v12 = vld [vmem:[#allocation2 + $0x10] sm:$0xff]  ;;  %v189_v43 = vshrl.u32 %v188_v42, 7 }
  0x3b   :  { %434 = vmatprep.mubr.msk.bf16.mxu0 %vm108_vm0, %v67_v5  ;;  %279 = vmatpush1.bf16.msra.mxu1 %v455_v7  ;;  %v458_v10 = vld [vmem:[#allocation7 + $0x10] ss:$8 sps:$4 sm:$0xff]   ;;  %v461_v14 = vld [vmem:[#allocation7 + $0x20] ss:$8 sps:$4 sm:$0xff]   ;;  %v462_v16 = vld [vmem:[#allocation7 + $0x34] ss:$8 sps:$4 sm:$0xff]  }
  0x3c   :  { %280 = vmatprep.subr.bf16.mxu1 %v456_v8  ;;  %v66_v13 = vld [vmem:[#allocation2 + $0x18] sm:$0xff]  ;;  %v465_v18 = vld [vmem:[#allocation7 + $0x44] ss:$8 sps:$4 sm:$0xff]   ;;  %v467_v19 = vld [vmem:[#allocation7 + $0x40] ss:$8 sps:$4 sm:$0xff]   ;;  %v190_v44 = vsub.s32 0, %v189_v43 }
  0x3d   :  { %429 = vmatpush3.bf16.msra.mxu0 %v450_v1  ;;  %v68_v15 = vpack.c.bf16 %v66_v13, %v65_v12  ;;  %v464_v17 = vld [vmem:[#allocation7 + $0x30] ss:$8 sps:$4 sm:$0xff]   ;;  %v468_v20 = vld [vmem:[#allocation7 + $0x54] ss:$8 sps:$4 sm:$0xff]   ;;  %v471_v22 = vld [vmem:[#allocation7 + $0x64] ss:$8 sps:$4 sm:$0xff]  }
  0x3e   :  { %430 = vmatprep.subr.bf16.mxu0 %v451_v2  ;;  %v470_v21 = vld [vmem:[#allocation7 + $0x50] ss:$8 sps:$4 sm:$0xff]   ;;  %v473_v23 = vld [vmem:[#allocation7 + $0x60] ss:$8 sps:$4 sm:$0xff]   ;;  %v474_v24 = vld [vmem:[#allocation7 + $0x74] ss:$8 sps:$4 sm:$0xff]  }
  0x3f   :  { %281 = vmatpush1.bf16.msra.mxu1 %v458_v10  ;;  %v476_v25 = vld [vmem:[#allocation7 + $0x70] ss:$8 sps:$4 sm:$0xff]   ;;  %v397_v27 = vld [vmem:[%s702_s2] ss:$0 sm:$0xff]  ;;  %v194_v46 = vsub.s32 1, %v189_v43 }
  0x40   :  { %282 = vmatprep.subr.bf16.mxu1 %v459_v11  ;;  %v186_v45 = vld [vmem:[%s704_s4] sm:$0x3]  ;;  %s611_s4 = smov [#allocation8]  }
  0x41   :  { %431 = vmatpush3.bf16.msra.mxu0 %v451_v2  ;;  %v191_v47 = vrot.slane %v186_v45, %v190_v44  ;;  %v195_v48 = vrot.slane %v186_v45, %v194_v46  ;;  %s384_s8 = sshll.u32 %s611_s4, 4  ;;  %s385_s8 = int_to_ptr.vmem [resolvable:$true] %s384_s8 }
  0x42   :  { %432 = vmatprep.subr.bf16.mxu0 %v452_v9  ;;  %s575_s9 = scalar_lea.vmem %s385_s8, 1024  ;;  %p580_p11 = scmp.lt.s32.totalorder %s385_s8, %s385_s8 }
  0x43   :  { %283 = vmatpush1.bf16.msra.mxu1 %v461_v14  ;;  %p576_p10 = scmp.ne.s32.totalorder %s385_s8, %s575_s9  ;;  %p581_p12 = scmp.lt.s32.totalorder %s575_s9, %s575_s9 }
  0x44   :  { %284 = vmatprep.subr.bf16.mxu1 %v462_v16 }
  0x45   :  { %433 = vmatpush3.bf16.msra.mxu0 %v452_v9  ;;  %p582_p13 = por %p581_p12, %p580_p11 }
  0x47   :  { %285 = vmatpush1.bf16.msra.mxu1 %v464_v17  ;;  %p583_p0 = pnand %p582_p13, %p576_p10 }
  0x48   :  { %435 = vmatmul.mubr.msk.bf16.vlgmr.msra.gmra.mrb[0].mxu0 %vm108_vm0, %v68_v15  ;;  %286 = vmatprep.subr.bf16.mxu1 %v465_v18 }
  0x4b   :  { %287 = vmatpush1.bf16.msra.mxu1 %v467_v19 }
  0x4c   :  { %288 = vmatprep.subr.bf16.mxu1 %v468_v20 }
  0x4f   :  { %289 = vmatpush1.bf16.msra.mxu1 %v470_v21 }
  0x50   :  { %290 = vmatprep.subr.bf16.mxu1 %v471_v22 }
  0x53   :  { %291 = vmatpush1.bf16.msra.mxu1 %v473_v23 }
  0x54   :  { %292 = vmatprep.subr.bf16.mxu1 %v474_v24 }
  0x57   :  { %293 = vmatpush1.bf16.msra.mxu1 %v476_v25 }
 0x11b   :  { %v436_v28 = vpop.f32.mrb[0].mxu0 }
 0x11c   :  { %v158_v29 = vadd.f32 %v436_v28, %v397_v27  ;;  %v149_v30 = vpop.f32.mrb[1].mxu0 }
 0x11d   :  { %v150_v31 = vadd.f32 %v397_v27, %v149_v30  ;;  %v437_v32 = vpop.f32.mrb[2].mxu0 }
 0x11e   :  { %v161_v33 = vadd.f32 %v437_v32, %v397_v27  ;;  %v152_v34 = vpop.f32.mrb[3].mxu0  ;;  %v166_v36 = vmax.f32 %v158_v29, 0.0 }
 0x11f   :  { %v153_v35 = vadd.f32 %v397_v27, %v152_v34  ;;  %v164_v38 = vmax.f32 %v150_v31, 0.0 }
 0x120   :  { %v167_v37 = vmax.f32 %v161_v33, 0.0 }
 0x121   :  { %v165_v39 = vmax.f32 %v153_v35, 0.0 }
 0x122   :  { %v169_v40 = vpack.c.bf16 %v167_v37, %v166_v36 }
 0x123   :  { %v168_v41 = vpack.c.bf16 %v165_v39, %v164_v38 }
 0x125   :  { %311 = vmatmul.mubr.bf16.vlgmr.msra.gmra.mrb[0].mxu1 %v168_v41 }
 0x126   :  { %320 = vmatprep.mubr.bf16.mxu1 %v610_v26 }
 0x12d   :  { %321 = vmatmul.mubr.bf16.gmra.mrb[4].mxu1 %v169_v40 }
 0x1f8   :  { %v312_v49 = vpop.f32.mrb[0].mxu1 }
 0x1f9   :  { %v313_v50 = vadd.f32 %v312_v49, %v191_v47  ;;  %v314_v51 = vpop.f32.mrb[1].mxu1 }
 0x1fa   :  { %v315_v52 = vadd.f32 %v314_v51, %v195_v48  ;;  %v316_v53 = vpop.f32.mrb[2].mxu1 }
 0x1fb   :  { %v331_v54 = vsub.f32 0.0, %v313_v50  ;;  %v317_v55 = vadd.f32 %v316_v53, %v191_v47  ;;  %v318_v56 = vpop.f32.mrb[3].mxu1 }
 0x1fc   :  { %v332_v57 = vsub.f32 0.0, %v315_v52  ;;  %v319_v58 = vadd.f32 %v318_v56, %v195_v48 }
 0x1fd   :  { %v339_v59 = vmul.f32 1.442695, %v331_v54  ;;  %v333_v60 = vsub.f32 0.0, %v317_v55 }
 0x1fe   :  { %v341_v61 = vmul.f32 1.442695, %v332_v57  ;;  %v334_v62 = vsub.f32 0.0, %v319_v58 }
 0x1ff   :  { %477 = vpow2.f32 %v339_v59  ;;  %v343_v63 = vmul.f32 1.442695, %v333_v60 }
 0x200   :  { %479 = vpow2.f32 %v341_v61  ;;  %v345_v0 = vmul.f32 1.442695, %v334_v62  ;;  %v322_v1 = vpop.f32.mrb[4].mxu1 }
 0x201   :  { %481 = vpow2.f32 %v343_v63  ;;  %v323_v2 = vadd.f32 %v322_v1, %v191_v47  ;;  %v324_v3 = vpop.f32.mrb[5].mxu1 }
 0x202   :  { %483 = vpow2.f32 %v345_v0  ;;  %v325_v4 = vadd.f32 %v324_v3, %v195_v48  ;;  %v326_v5 = vpop.f32.mrb[6].mxu1 }
 0x203   :  { %v335_v6 = vsub.f32 0.0, %v323_v2  ;;  %v327_v7 = vadd.f32 %v326_v5, %v191_v47  ;;  %v328_v8 = vpop.f32.mrb[7].mxu1 }
 0x204   :  { %v336_v9 = vsub.f32 0.0, %v325_v4  ;;  %v329_v10 = vadd.f32 %v328_v8, %v195_v48 }
 0x205   :  { %v347_v11 = vmul.f32 1.442695, %v335_v6  ;;  %v337_v12 = vsub.f32 0.0, %v327_v7 }
 0x206   :  { %v349_v13 = vmul.f32 1.442695, %v336_v9  ;;  %v338_v14 = vsub.f32 0.0, %v329_v10 }
 0x207   :  { %485 = vpow2.f32 %v347_v11  ;;  %v351_v15 = vmul.f32 1.442695, %v337_v12 }
 0x208   :  { %487 = vpow2.f32 %v349_v13  ;;  %v353_v16 = vmul.f32 1.442695, %v338_v14 }
 0x209   :  { %v478_v17 = vpop.eup %477  ;;  %489 = vpow2.f32 %v351_v15 }
 0x20a   :  { %v480_v18 = vpop.eup %479  ;;  %v355_v19 = vadd.f32 1.0, %v478_v17  ;;  %491 = vpow2.f32 %v353_v16 }
 0x20b   :  { %v482_v20 = vpop.eup %481  ;;  %v356_v21 = vadd.f32 1.0, %v480_v18 }
 0x20c   :  { %v484_v22 = vpop.eup %483  ;;  %493 = vrcp.f32 %v355_v19  ;;  %v357_v23 = vadd.f32 1.0, %v482_v20 }
 0x20d   :  { %495 = vrcp.f32 %v356_v21  ;;  %v358_v24 = vadd.f32 1.0, %v484_v22 }
 0x20e   :  { %497 = vrcp.f32 %v357_v23 }
 0x20f   :  { %499 = vrcp.f32 %v358_v24 }
 0x211   :  { %v486_v25 = vpop.eup %485 }
 0x212   :  { %v488_v26 = vpop.eup %487  ;;  %v359_v27 = vadd.f32 1.0, %v486_v25 }
 0x213   :  { %v490_v28 = vpop.eup %489  ;;  %v360_v29 = vadd.f32 1.0, %v488_v26 }
 0x214   :  { %v492_v30 = vpop.eup %491  ;;  %501 = vrcp.f32 %v359_v27  ;;  %v361_v31 = vadd.f32 1.0, %v490_v28 }
 0x215   :  { %503 = vrcp.f32 %v360_v29  ;;  %v362_v32 = vadd.f32 1.0, %v492_v30 }
 0x216   :  { %v494_v33 = vpop.eup %493  ;;  %505 = vrcp.f32 %v361_v31 }
 0x217   :  { %v496_v34 = vpop.eup %495  ;;  %371 = vst [vmem:[#allocation8] sm:$0xff] %v494_v33  ;;  %507 = vrcp.f32 %v362_v32 }
 0x218   :  { %v498_v35 = vpop.eup %497  ;;  %372 = vst [vmem:[#allocation8 + $0x8] sm:$0xff] %v496_v34 }
 0x219   :  { %v500_v36 = vpop.eup %499  ;;  %373 = vst [vmem:[#allocation8 + $0x10] sm:$0xff] %v498_v35 }
 0x21a   :  { %374 = vst [vmem:[#allocation8 + $0x18] sm:$0xff] %v500_v36 }
 0x21e   :  { %v502_v37 = vpop.eup %501 }
 0x21f   :  { %v504_v38 = vpop.eup %503  ;;  %375 = vst [vmem:[#allocation8 + $0x20] sm:$0xff] %v502_v37 }
 0x220   :  { %v506_v39 = vpop.eup %505  ;;  %376 = vst [vmem:[#allocation8 + $0x28] sm:$0xff] %v504_v38 }
 0x221   :  { %v508_v40 = vpop.eup %507  ;;  %377 = vst [vmem:[#allocation8 + $0x30] sm:$0xff] %v506_v39 }
 0x222   :  { %378 = vst [vmem:[#allocation8 + $0x38] sm:$0xff] %v508_v40 }
 0x223   :  { %586 = shalt.err (!%p583_p0)
}
 0x224   :  { %s587_s12 = scalar_lea.hbm %s705_s5, 1024 }
 0x225   :  { %p588_p1 = scmp.ne.s32.totalorder %s705_s5, %s587_s12  ;;  %p591_p2 = scmp.lt.u32.totalorder %s587_s12, %s705_s5 }
 0x227   :  { %p593_p3 = pnand %p591_p2, %p588_p1 }
 0x229   :  { %596 = shalt.err (!%p593_p3)
}
 0x22a   :  { %s612_s1 = smov 256   ;;  %s613_s17 = smov 16  }
 0x22b   :  { %390 = dma.vmem_to_hbm [thread:$0]  %s385_s8, 1024, %s705_s5, [#allocation4], %s612_s1, %s612_s1, %s613_s17  }
 0x22c   :  { %601 = dma.done.wait [#allocation4], 1024  }
 0x22d   :  { %602 = vsyncadd [#allocation4], 4294966272 }
 0x22e   :  { %394 = vsyncpa [#allocation3], 1 }
 0x22f   :  { %395 = vsyncpa [#allocation6], 1 }
 0x230   :  { %396 = vsyncpa [#allocation4], 1 }

</bundles_post_ra>
